<compile_context>
chip_gen: v7x
topology: tpu7x:2x2x1
jax: 0.10.0
libtpu: 0.0.40
codegen_flags: <defaults>
</compile_context>

<pallas_src>
import jax
import jax.numpy as jnp
from jax import lax
from jax.experimental import pallas as pl
from jax.experimental.pallas import tpu as pltpu

K = 5          # tconv kernel size
PAD = 2        # tconv padding
HIDDEN = 512   # tconv output channels (folded away by the algebraic collapse)
LANE = 128     # TPU lane width


def _round_up(x, m):
    return (x + m - 1) // m * m


def tconv_kernel(w_ref, b_ref, xp_ref, o_ref):
    # w_ref : (CLS_pad, KC_pad)  bf16   fused (classes x K*C) weight
    # b_ref : (CLS_pad, 1)       f32    fused bias
    # xp_ref: (KC_pad, TM)       bf16   im2col patches, rows (=B*T) on lanes
    # o_ref : (CLS_pad, TM)      f32    class-major, lane-dense output store
    y = jnp.dot(w_ref[...], xp_ref[...], preferred_element_type=jnp.float32)
    o_ref[...] = y + b_ref[...]


def _pick_row_tile(rows):
    # rows live on the LANE axis -> tile must be a multiple of 128 (or the full
    # dim).  Cap at 8192: per-step footprint (in + out, double-buffered) is
    # ~2 MiB, far under every generation's scoped-VMEM default, while a ~1 MiB
    # DMA per step hides the ~0.35 us per-grid-step fixed overhead.
    rows128 = _round_up(rows, LANE)
    if rows128 <= 256:
        return rows128
    # aim for >= 2 grid steps (v7x megacore) with the biggest tile that allows it
    tile = min(8192, _round_up(rows128 // 2, LANE))
    return max(LANE, tile)


def tconv_pallas(w_eff, b_eff, patches):
    cls_pad, kc_pad = w_eff.shape
    _, rows = patches.shape
    tm = _pick_row_tile(rows)
    n_steps = pl.cdiv(rows, tm)
    if n_steps > 1 and n_steps % 2 == 1:
        n_steps += 1                      # even step count keeps both v7x TCs busy
    rows_pad = n_steps * tm
    if rows_pad != rows:
        patches = jnp.pad(patches, ((0, 0), (0, rows_pad - rows)))

    out = pl.pallas_call(
        tconv_kernel,
        out_shape=jax.ShapeDtypeStruct((cls_pad, rows_pad), jnp.float32),
        grid_spec=pltpu.PrefetchScalarGridSpec(
            num_scalar_prefetch=0,
            grid=(n_steps,),
            in_specs=[
                pl.BlockSpec((cls_pad, kc_pad), lambda i: (0, 0)),  # resident weight
                pl.BlockSpec((cls_pad, 1), lambda i: (0, 0)),       # resident bias
                pl.BlockSpec((kc_pad, tm), lambda i: (0, i)),       # streamed patches
            ],
            out_specs=pl.BlockSpec((cls_pad, tm), lambda i: (0, i)),
        ),
        compiler_params=pltpu.CompilerParams(
            dimension_semantics=("parallel",)),
    )(w_eff, b_eff, patches)
    return out


def _squeeze_pad(x):
    """Mirrors the PyTorch squeeze / short-sequence pad logic, but squeezes the
    singleton dim explicitly so C_in==1 can't collapse the channel axis."""
    if x.ndim == 4:
        x = x[:, 0]                       # (B, 1, C, T) -> (B, C, T)
    t = x.shape[-1]
    if t < 10:
        pad = (10 - t + 1) // 2
        x = jnp.pad(x, ((0, 0), (0, 0), (pad, pad)))
    return x


def tconv_forward(x, lens, params):
    """Mirrors TConv.forward. x is (B, 1, C_in, T); `lens` is unused (as in torch)."""
    del lens
    w1, b1, w2, b2 = params  # torch layouts: (512,C,5), (512,), (cls,512,1), (cls,)

    x = _squeeze_pad(x)                                     # (B, C, T)
    B, C, T = x.shape
    classes = w2.shape[0]

    kc = K * C
    kc_pad = _round_up(kc, 16)           # bf16 sublane packing (16-row granularity)
    cls_pad = _round_up(classes, 16)     # bf16-safe sublane count, still small

    # --- algebraic collapse of the two bias-only convs (done once, in f32) ---
    w2m = w2[:, :, 0].astype(jnp.float32)                               # (cls, 512)
    w_eff = jnp.einsum('jo,ock->jkc', w2m, w1.astype(jnp.float32))      # (cls, K, C) k-major
    w_eff = w_eff.reshape(classes, kc)
    w_eff = jnp.pad(w_eff, ((0, cls_pad - classes), (0, kc_pad - kc))).astype(jnp.bfloat16)
    b_eff = w2m @ b1.astype(jnp.float32) + b2.astype(jnp.float32)       # (cls,)
    b_eff = jnp.pad(b_eff, (0, cls_pad - classes)).reshape(cls_pad, 1)

    # --- im2col in bf16, transposed so rows (=B*T) land on the lane axis ---
    xb = x.astype(jnp.bfloat16)
    x_tp = jnp.pad(xb, ((0, 0), (0, 0), (PAD, PAD)))                    # (B, C, T+4)
    taps = jnp.stack([x_tp[:, :, k:k + T] for k in range(K)], axis=0)   # (K, B, C, T)
    patches = jnp.transpose(taps, (0, 2, 1, 3)).reshape(kc, B * T)      # (K*C, B*T)
    patches = jnp.pad(patches, ((0, kc_pad - kc), (0, 0)))

    out = tconv_pallas(w_eff, b_eff, patches)               # (cls_pad, rows_pad) f32
    out = out[:classes, :B * T].reshape(classes, B, T)
    return jnp.transpose(out, (1, 0, 2))                    # (B, classes, T) == torch NCL


# ------------------------------ references ---------------------------------

def tconv_reference_quant(x, params):
    """Fused-weight reference with the SAME bf16 quantization the kernel feeds
    the MXU (tight comparison)."""
    w1, b1, w2, b2 = params
    x = _squeeze_pad(x)
    B, C, T = x.shape
    w_eff = jnp.einsum('jo,ock->jck', w2[:, :, 0], w1)                  # (cls, C, K) f32
    b_eff = w2[:, :, 0] @ b1 + b2
    xq = x.astype(jnp.bfloat16).astype(jnp.float32)
    wq = w_eff.astype(jnp.bfloat16).astype(jnp.float32)
    x_pad = jnp.pad(xq, ((0, 0), (0, 0), (PAD, PAD)))
    taps = jnp.stack([x_pad[:, :, k:k + T] for k in range(K)], axis=3)  # (B, C, T, K)
    y = jnp.einsum('jck,bctk->bjt', wq, taps, precision=lax.Precision.HIGHEST)
    return y + b_eff[None, :, None]


def tconv_reference_f32(x, params):
    """Un-fused, un-quantized reference (the original two-conv math)."""
    w1, b1, w2, b2 = params
    x = _squeeze_pad(x)
    dn = lax.conv_dimension_numbers(x.shape, w1.shape, ("NCH", "OIH", "NCH"))
    h = lax.conv_general_dilated(x, w1, (1,), [(PAD, PAD)], dimension_numbers=dn,
                                 precision=lax.Precision.HIGHEST)
    h = h + b1[None, :, None]
    dn2 = lax.conv_dimension_numbers(h.shape, w2.shape, ("NCH", "OIH", "NCH"))
    y = lax.conv_general_dilated(h, w2, (1,), [(0, 0)], dimension_numbers=dn2,
                                 precision=lax.Precision.HIGHEST)
    return y + b2[None, :, None]


if __name__ == "__main__":
    B, C_in, T, CLASSES = 2, 4, 16, 8

    key = jax.random.PRNGKey(0)
    kx, k1, k2, k3, k4 = jax.random.split(key, 5)

    # deterministic parameter init (torch-style uniform fan-in scaling)
    bound1 = 1.0 / (C_in * K) ** 0.5
    w1 = jax.random.uniform(k1, (HIDDEN, C_in, K), jnp.float32, -bound1, bound1)
    b1 = jax.random.uniform(k2, (HIDDEN,), jnp.float32, -bound1, bound1)
    bound2 = 1.0 / (HIDDEN * 1) ** 0.5
    w2 = jax.random.uniform(k3, (CLASSES, HIDDEN, 1), jnp.float32, -bound2, bound2)
    b2 = jax.random.uniform(k4, (CLASSES,), jnp.float32, -bound2, bound2)
    params = (w1, b1, w2, b2)

    # input shaped like the PyTorch caller would pass it: (B, 1, C_in, T)
    x = jax.random.normal(kx, (B, 1, C_in, T), jnp.float32)
    lens = jnp.full((B,), T, jnp.int32)   # unused, as in the reference forward

    out = tconv_forward(x, lens, params)
    out = jax.block_until_ready(out)
    assert out.shape == (B, CLASSES, T), out.shape

    # tight check vs. quantized fused reference (same bf16 operands as the MXU sees)
    ref_q = tconv_reference_quant(x, params)
    err_q = float(jnp.max(jnp.abs(out - ref_q)))
    assert jnp.allclose(out, ref_q, atol=2e-3, rtol=2e-3), err_q

    # loose check vs. the original un-fused f32 two-conv math (fusion semantics)
    ref_f = tconv_reference_f32(x, params)
    err_f = float(jnp.max(jnp.abs(out - ref_f)))
    assert jnp.allclose(out, ref_f, atol=3e-2, rtol=3e-2), err_f

    print("KERNEL_OK")
</pallas_src>

<mosaic_0001>
module attributes {stable_mosaic.version = 11 : i64} {
  func.func @tconv_kernel(%arg0: i32, %arg1: memref<16x32xbf16, #tpu.memory_space<vmem>>, %arg2: memref<16x1xf32, #tpu.memory_space<vmem>>, %arg3: memref<32x128xbf16, #tpu.memory_space<vmem>>, %arg4: memref<16x128xf32, #tpu.memory_space<vmem>>) attributes {dimension_semantics = [#tpu.dimension_semantics<parallel>], iteration_bounds = array<i64: 1>, scalar_prefetch = 0 : i64, scratch_operands = 0 : i64, tpu.core_type = #tpu.core_type<tc>, window_params = [{pipeline_mode = #tpu.pipeline_mode<synchronous>, transform_indices = @transform_0, window_bounds = array<i64: 16, 32>}, {pipeline_mode = #tpu.pipeline_mode<synchronous>, transform_indices = @transform_1, window_bounds = array<i64: 16, 1>}, {transform_indices = @transform_2, window_bounds = array<i64: 32, 128>}, {transform_indices = @transform_3, window_bounds = array<i64: 16, 128>}]} {
    %c0 = arith.constant 0 : index
    %c0_0 = arith.constant 0 : index
    %0 = vector.load %arg1[%c0, %c0_0] : memref<16x32xbf16, #tpu.memory_space<vmem>>, vector<16x32xbf16>
    %c0_1 = arith.constant 0 : index
    %c0_2 = arith.constant 0 : index
    %1 = vector.load %arg3[%c0_1, %c0_2] : memref<32x128xbf16, #tpu.memory_space<vmem>>, vector<32x128xbf16>
    %cst = arith.constant dense<0.000000e+00> : vector<16x128xf32>
    %2 = tpu.matmul %0, %1, %cst {dimension_numbers = #tpu.dot_dimension_numbers<[1], [0], [0], [1], [0, 0, 1, 1], [], []>} : vector<16x32xbf16>, vector<32x128xbf16>, vector<16x128xf32> -> vector<16x128xf32>
    %c0_3 = arith.constant 0 : index
    %c0_4 = arith.constant 0 : index
    %3 = vector.load %arg2[%c0_3, %c0_4] : memref<16x1xf32, #tpu.memory_space<vmem>>, vector<16x1xf32>
    %4 = vector.broadcast %3 : vector<16x1xf32> to vector<16x128xf32>
    %5 = arith.addf %2, %4 : vector<16x128xf32>
    %c0_5 = arith.constant 0 : index
    %c0_6 = arith.constant 0 : index
    %6 = vector.load %arg4[%c0_5, %c0_6] : memref<16x128xf32, #tpu.memory_space<vmem>>, vector<16x128xf32>
    tpu.vector_store %arg4[%c0_5, %c0_6], %5 {strides = array<i32>} : memref<16x128xf32, #tpu.memory_space<vmem>>, vector<16x128xf32>,
    return
  }
  func.func @transform_0(%arg0: i32) -> (i32, i32) {
    %c0_i32 = arith.constant 0 : i32
    %c0_i32_0 = arith.constant 0 : i32
    %c0_i32_1 = arith.constant 0 : i32
    return %c0_i32, %c0_i32_0 : i32, i32
  }
  func.func @transform_1(%arg0: i32) -> (i32, i32) {
    %c0_i32 = arith.constant 0 : i32
    %c0_i32_0 = arith.constant 0 : i32
    %c0_i32_1 = arith.constant 0 : i32
    return %c0_i32, %c0_i32_0 : i32, i32
  }
  func.func @transform_2(%arg0: i32) -> (i32, i32) {
    %c0_i32 = arith.constant 0 : i32
    %c0_i32_0 = arith.constant 0 : i32
    return %c0_i32, %arg0 : i32, i32
  }
  func.func @transform_3(%arg0: i32) -> (i32, i32) {
    %c0_i32 = arith.constant 0 : i32
    %c0_i32_0 = arith.constant 0 : i32
    return %c0_i32, %arg0 : i32, i32
  }
}

</mosaic_0001>

<bundles_post_ra>
// kernel: tpu_custom_call.1
= control target key start
LH: loop header
LB: loop body
LE: loop exit
PB: predicated region body
PF: predicated region fallthrough
CT: control target
= control target key end

     0   :  { %v163_v1 = vmov 0.0   ;;  %vm164_vm0 = vmmov 0   ;;  %s216_s0 = inlined_call_operand.vmem [shape: bf16[16,32], index: 0, kind: input, shape index: {}]   ;;  %s217_s1 = inlined_call_operand.vmem [shape: f32[16,1], index: 1, kind: input, shape index: {}]   ;;  %s218_s2 = inlined_call_operand.vmem [shape: bf16[32,128], index: 2, kind: input, shape index: {}]   ;;  %s219_s3 = inlined_call_operand.hbm [shape: f32[16,128], index: 3, kind: output, shape index: {}]  }
   0x1   :  { %v136_v0 = vld [vmem:[%s218_s2] sm:$0xff]   ;;  %121 = vmatprep.subr.bf16.mxu0 %v163_v1  ;;  %v137_v2 = vld [vmem:[%s218_s2 + $0x8] sm:$0xff]   ;;  %125 = vmatprep.mubr.msk.bf16.mxu0 %vm164_vm0, %v163_v1 }
   0x2   :  { %122 = vmatpush3.bf16.msra.mxu0 %v136_v0  ;;  %v22_v3 = vld [vmem:[%s217_s1] sm:$0xff] }
   0x3   :  { %123 = vmatprep.subr.bf16.mxu0 %v163_v1 }
   0x4   :  { %8 = vsyncpa [#allocation3], 0  ;;  %v165_v4 = vmov 0   ;;  %v138_v5 = vld [vmem:[%s216_s0] sm:$0xff]   ;;  %vm51_vm1 = vcmask 261120   ;;  %v23_v6 = vld [vmem:[%s217_s1 + $0x8] sm:$0xff] }
   0x5   :  { %135 = vset.pattern.permute.xlu0 %v165_v4  ;;  %s166_s2 = smov [#allocation2]  }
   0x6   :  { %26 = vperm.xlu0 %135, %v22_v3   ;;  %124 = vmatpush3.bf16.msra.mxu0 %v137_v2  ;;  %s103_s22 = sshll.u32 %s166_s2, 4  ;;  %s104_s22 = int_to_ptr.vmem [resolvable:$true] %s103_s22 }
   0x7   :  { %s139_s0 = scalar_lea.vmem %s104_s22, 256  ;;  %p144_p1 = scmp.lt.s32.totalorder %s104_s22, %s104_s22 }
   0x8   :  { %p140_p0 = scmp.ne.s32.totalorder %s104_s22, %s139_s0  ;;  %p145_p2 = scmp.lt.s32.totalorder %s139_s0, %s139_s0 }
   0x9   :  { %126 = vmatmul.mubr.msk.bf16.vlgmr.msra.gmra.mrb[0].mxu0 %vm51_vm1, %v138_v5 }
   0xa   :  { %31 = vperm.xlu0 %135, %v23_v6   ;;  %p146_p3 = por %p145_p2, %p144_p1 }
   0xc   :  { %p147_p4 = pnand %p146_p3, %p140_p0 }
  0x85   :  { %v27_v7 = vpop.permute.xlu0 %26 }
  0x89   :  { %v32_v11 = vpop.permute.xlu0 %31 }
  0xdc   :  { %v89_v8 = vpop.f32.mrb[0].mxu0 }
  0xdd   :  { %v90_v9 = vadd.f32 %v89_v8, %v27_v7  ;;  %v127_v10 = vpop.f32.mrb[1].mxu0 }
  0xde   :  { %v92_v12 = vpop.f32.mrb[2].mxu0 }
  0xdf   :  { %96 = vst [vmem:[#allocation2] sm:$0xff] %v90_v9  ;;  %v93_v13 = vadd.f32 %v92_v12, %v32_v11  ;;  %v128_v14 = vpop.f32.mrb[3].mxu0 }
  0xe1   :  { %97 = vst [vmem:[#allocation2 + $0x8] sm:$0xff] %v93_v13 }
  0xe2   :  { %150 = shalt.err (!%p147_p4)
}
  0xe3   :  { %s151_s24 = scalar_lea.hbm %s219_s3, 256 }
  0xe4   :  { %p152_p5 = scmp.ne.s32.totalorder %s219_s3, %s151_s24  ;;  %p155_p6 = scmp.lt.u32.totalorder %s151_s24, %s219_s3 }
  0xe6   :  { %p157_p7 = pnand %p155_p6, %p152_p5 }
  0xe8   :  { %160 = shalt.err (!%p157_p7)
}
  0xe9   :  { %s167_s29 = smov 128   ;;  %s168_s30 = smov 8  }
  0xea   :  { %109 = dma.vmem_to_hbm [thread:$0]  %s104_s22, 256, %s219_s3, [#allocation3], %s167_s29, %s167_s29, %s168_s30  }
  0xeb   :  { %161 = dma.done.wait [#allocation3], 256  }
  0xec   :  { %162 = vsyncadd [#allocation3], 4294967040 }
  0xed   :  { %113 = vsyncpa [#allocation3], 1 }

</bundles_post_ra>
